<compile_context>
chip_gen: v6e
topology: v6e:2x2x1
jax: 0.10.0
libtpu: 0.0.40
codegen_flags: <defaults>
</compile_context>

<pallas_src>
import jax
import jax.numpy as jnp
from jax import lax
from jax.experimental import pallas as pl
from jax.experimental.pallas import tpu as pltpu  # noqa: F401  (TPU backend)


def lstm_mlp_kernel(x_ref, wih_ref, whh_ref, b_ref,
                    w1_ref, b1_ref, w2_ref, b2_ref, y_ref):
    seq_len = x_ref.shape[0]
    H = whh_ref.shape[0]

    # Hoist the recurrent weight load: W_hh (H, 4H) bf16 stays in vregs for the
    # whole recurrence instead of being re-loaded every unrolled step.
    whh = whh_ref[...]
    bias = b_ref[...]                                     # (1, 4H) f32

    # (1) Hoisted input projection: one batched MXU push for all time steps.
    #     gx[t] = x_t @ W_ih^T + (b_ih + b_hh)            -> (seq_len, 4H) f32
    gx = jnp.dot(x_ref[...], wih_ref[...],
                 preferred_element_type=jnp.float32) + bias

    # (2) Fully-unrolled LSTM recurrence (zero initial state, PyTorch gate
    #     order i, f, g, o).  Hidden states are accumulated into a
    #     register-resident (seq_len, H) value with iota-masked selects —
    #     no VMEM scratch traffic on the serial critical path.
    row_ids = lax.broadcasted_iota(jnp.int32, (seq_len, H), 0)
    hs = jnp.zeros((seq_len, H), jnp.float32)
    h = jnp.zeros((1, H), jnp.float32)
    c = jnp.zeros((1, H), jnp.float32)
    for t in range(seq_len):
        gates = gx[t:t + 1, :] + jnp.dot(
            h.astype(jnp.bfloat16), whh, preferred_element_type=jnp.float32)

        # One EUP pass each over the full 4H vreg; the four slices below are
        # then independent of each other.
        sig = jax.nn.sigmoid(gates)
        tg = jnp.tanh(gates)
        i_g = sig[:, 0:H]
        f_g = sig[:, H:2 * H]
        g_g = tg[:, 2 * H:3 * H]
        o_g = sig[:, 3 * H:4 * H]

        c = f_g * c + i_g * g_g
        h = o_g * jnp.tanh(c)
        hs = jnp.where(row_ids == t, h, hs)

    # (3) Regressor head, batched over all time steps, single output store:
    #     y = ReLU(H_all @ W1^T + b1) @ W2^T + b2
    hid = jnp.maximum(
        jnp.dot(hs.astype(jnp.bfloat16), w1_ref[...],
                preferred_element_type=jnp.float32) + b1_ref[...],
        0.0)
    y = jnp.dot(hid.astype(jnp.bfloat16), w2_ref[...],
                preferred_element_type=jnp.float32) + b2_ref[...]
    y_ref[...] = y.astype(y_ref.dtype)


def model_forward(x, params):
    """x: (seq_len, 1, input_dim) float32. Returns y: (seq_len, output_dim) f32."""
    seq_len, batch, input_dim = x.shape
    assert batch == 1, "Module hard-codes batch=1 via init_hidden()"
    wih_t, whh_t, b, w1_t, b1, w2_t, b2 = params
    output_dim = w2_t.shape[1]

    x2d = x.reshape(seq_len, input_dim).astype(jnp.bfloat16)

    # No grid: the whole ~30 KB working set (sequence, weights, output) lives
    # in VMEM for the single kernel invocation; full-array default blocks.
    y = pl.pallas_call(
        lstm_mlp_kernel,
        out_shape=jax.ShapeDtypeStruct((seq_len, output_dim), jnp.float32),
    )(x2d, wih_t, whh_t, b, w1_t, b1, w2_t, b2)
    return y


def init_params(key, input_dim, hidden_dim, output_dim):
    ks = jax.random.split(key, 8)
    s = 0.1
    w_ih = s * jax.random.normal(ks[0], (4 * hidden_dim, input_dim), jnp.float32)
    w_hh = s * jax.random.normal(ks[1], (4 * hidden_dim, hidden_dim), jnp.float32)
    b_ih = s * jax.random.normal(ks[2], (4 * hidden_dim,), jnp.float32)
    b_hh = s * jax.random.normal(ks[3], (4 * hidden_dim,), jnp.float32)
    w1 = s * jax.random.normal(ks[4], (hidden_dim, hidden_dim), jnp.float32)
    b1 = s * jax.random.normal(ks[5], (hidden_dim,), jnp.float32)
    w2 = s * jax.random.normal(ks[6], (output_dim, hidden_dim), jnp.float32)
    b2 = s * jax.random.normal(ks[7], (output_dim,), jnp.float32)
    # Pre-transpose for row-vector @ matrix inside the kernel, fold the two
    # LSTM biases, and cast matmul operands to bf16 (f32 accumulation happens
    # on the MXU via preferred_element_type); biases stay f32.
    params = (w_ih.T.astype(jnp.bfloat16),
              w_hh.T.astype(jnp.bfloat16),
              (b_ih + b_hh)[None, :],
              w1.T.astype(jnp.bfloat16), b1[None, :],
              w2.T.astype(jnp.bfloat16), b2[None, :])
    raw = (w_ih, w_hh, b_ih, b_hh, w1, b1, w2, b2)
    return params, raw


def reference_forward(x, raw):
    """Pure-JAX f32 reference matching PyTorch nn.LSTM + regressor semantics."""
    w_ih, w_hh, b_ih, b_hh, w1, b1, w2, b2 = raw
    H = w_hh.shape[1]
    xs = x[:, 0, :]  # (seq, input_dim)

    def step(carry, x_t):
        h, c = carry
        gates = x_t @ w_ih.T + h @ w_hh.T + b_ih + b_hh
        i = jax.nn.sigmoid(gates[0:H])
        f = jax.nn.sigmoid(gates[H:2 * H])
        g = jnp.tanh(gates[2 * H:3 * H])
        o = jax.nn.sigmoid(gates[3 * H:4 * H])
        c = f * c + i * g
        h = o * jnp.tanh(c)
        return (h, c), h

    (_, _), hs = lax.scan(step, (jnp.zeros(H), jnp.zeros(H)), xs)
    hid = jnp.maximum(hs @ w1.T + b1, 0.0)
    return hid @ w2.T + b2


if __name__ == "__main__":
    input_dim, hidden_dim, output_dim = 4, 32, 2
    seq_len = 8

    key = jax.random.PRNGKey(0)
    k_x, k_p = jax.random.split(key)
    x = jax.random.normal(k_x, (seq_len, 1, input_dim), jnp.float32)
    params, raw = init_params(k_p, input_dim, hidden_dim, output_dim)

    y = model_forward(x, params)
    jax.block_until_ready(y)

    y_ref = reference_forward(x, raw)
    assert y.shape == (seq_len, output_dim)
    # bf16 matmul operands with f32 accumulation -> loosened tolerance.
    assert jnp.max(jnp.abs(y - y_ref)) < 2e-2

    print("KERNEL_OK")
</pallas_src>

<mosaic_0001>
module attributes {stable_mosaic.version = 11 : i64} {
  func.func @lstm_mlp_kernel(%arg0: memref<8x4xbf16, #tpu.memory_space<vmem>>, %arg1: memref<4x128xbf16, #tpu.memory_space<vmem>>, %arg2: memref<32x128xbf16, #tpu.memory_space<vmem>>, %arg3: memref<1x128xf32, #tpu.memory_space<vmem>>, %arg4: memref<32x32xbf16, #tpu.memory_space<vmem>>, %arg5: memref<1x32xf32, #tpu.memory_space<vmem>>, %arg6: memref<32x2xbf16, #tpu.memory_space<vmem>>, %arg7: memref<1x2xf32, #tpu.memory_space<vmem>>, %arg8: memref<8x2xf32, #tpu.memory_space<vmem>>) attributes {dimension_semantics = [], scalar_prefetch = 0 : i64, scratch_operands = 0 : i64, tpu.core_type = #tpu.core_type<tc>} {
    %c0 = arith.constant 0 : index
    %c0_0 = arith.constant 0 : index
    %0 = vector.load %arg2[%c0, %c0_0] : memref<32x128xbf16, #tpu.memory_space<vmem>>, vector<32x128xbf16>
    %c0_1 = arith.constant 0 : index
    %c0_2 = arith.constant 0 : index
    %1 = vector.load %arg3[%c0_1, %c0_2] : memref<1x128xf32, #tpu.memory_space<vmem>>, vector<1x128xf32>
    %c0_3 = arith.constant 0 : index
    %c0_4 = arith.constant 0 : index
    %2 = vector.load %arg0[%c0_3, %c0_4] : memref<8x4xbf16, #tpu.memory_space<vmem>>, vector<8x4xbf16>
    %c0_5 = arith.constant 0 : index
    %c0_6 = arith.constant 0 : index
    %3 = vector.load %arg1[%c0_5, %c0_6] : memref<4x128xbf16, #tpu.memory_space<vmem>>, vector<4x128xbf16>
    %cst = arith.constant dense<0.000000e+00> : vector<8x128xf32>
    %4 = tpu.matmul %2, %3, %cst {dimension_numbers = #tpu.dot_dimension_numbers<[1], [0], [0], [1], [0, 0, 1, 1], [], []>} : vector<8x4xbf16>, vector<4x128xbf16>, vector<8x128xf32> -> vector<8x128xf32>
    %5 = vector.broadcast %1 : vector<1x128xf32> to vector<8x128xf32>
    %6 = arith.addf %4, %5 : vector<8x128xf32>
    %7 = tpu.iota {dimensions = array<i32: 0>} : vector<8x32xi32>
    %cst_7 = arith.constant 0.000000e+00 : f32
    %8 = vector.broadcast %cst_7 : f32 to vector<8x32xf32>
    %cst_8 = arith.constant 0.000000e+00 : f32
    %9 = vector.broadcast %cst_8 : f32 to vector<1x32xf32>
    %cst_9 = arith.constant 0.000000e+00 : f32
    %10 = vector.broadcast %cst_9 : f32 to vector<1x32xf32>
    %11 = vector.extract_strided_slice %6 {offsets = [0, 0], sizes = [1, 128], strides = [1, 1]} : vector<8x128xf32> to vector<1x128xf32>
    %12 = arith.truncf %9 : vector<1x32xf32> to vector<1x32xbf16>
    %cst_10 = arith.constant dense<0.000000e+00> : vector<1x128xf32>
    %13 = tpu.matmul %12, %0, %cst_10 {dimension_numbers = #tpu.dot_dimension_numbers<[1], [0], [0], [1], [0, 0, 1, 1], [], []>} : vector<1x32xbf16>, vector<32x128xbf16>, vector<1x128xf32> -> vector<1x128xf32>
    %14 = arith.addf %11, %13 : vector<1x128xf32>
    %15 = arith.negf %14 : vector<1x128xf32>
    %16 = math.exp %15 : vector<1x128xf32>
    %cst_11 = arith.constant 1.000000e+00 : f32
    %17 = vector.broadcast %cst_11 : f32 to vector<1x128xf32>
    %18 = arith.addf %17, %16 : vector<1x128xf32>
    %19 = arith.divf %17, %18 : vector<1x128xf32>
    %20 = math.tanh %14 : vector<1x128xf32>
    %21 = vector.extract_strided_slice %19 {offsets = [0, 0], sizes = [1, 32], strides = [1, 1]} : vector<1x128xf32> to vector<1x32xf32>
    %22 = vector.extract_strided_slice %19 {offsets = [0, 32], sizes = [1, 32], strides = [1, 1]} : vector<1x128xf32> to vector<1x32xf32>
    %23 = vector.extract_strided_slice %20 {offsets = [0, 64], sizes = [1, 32], strides = [1, 1]} : vector<1x128xf32> to vector<1x32xf32>
    %24 = vector.extract_strided_slice %19 {offsets = [0, 96], sizes = [1, 32], strides = [1, 1]} : vector<1x128xf32> to vector<1x32xf32>
    %25 = arith.mulf %22, %10 : vector<1x32xf32>
    %26 = arith.mulf %21, %23 : vector<1x32xf32>
    %27 = arith.addf %25, %26 : vector<1x32xf32>
    %28 = math.tanh %27 : vector<1x32xf32>
    %29 = arith.mulf %24, %28 : vector<1x32xf32>
    %c0_i32 = arith.constant 0 : i32
    %30 = vector.broadcast %c0_i32 : i32 to vector<8x32xi32>
    %31 = arith.cmpi eq, %7, %30 : vector<8x32xi32>
    %32 = vector.shape_cast %29 : vector<1x32xf32> to vector<1x32xf32>
    %33 = vector.broadcast %32 : vector<1x32xf32> to vector<8x32xf32>
    %34 = arith.select %31, %33, %8 : vector<8x32xi1>, vector<8x32xf32>
    %35 = vector.extract_strided_slice %6 {offsets = [1, 0], sizes = [1, 128], strides = [1, 1]} : vector<8x128xf32> to vector<1x128xf32>
    %36 = arith.truncf %29 : vector<1x32xf32> to vector<1x32xbf16>
    %cst_12 = arith.constant dense<0.000000e+00> : vector<1x128xf32>
    %37 = tpu.matmul %36, %0, %cst_12 {dimension_numbers = #tpu.dot_dimension_numbers<[1], [0], [0], [1], [0, 0, 1, 1], [], []>} : vector<1x32xbf16>, vector<32x128xbf16>, vector<1x128xf32> -> vector<1x128xf32>
    %38 = arith.addf %35, %37 : vector<1x128xf32>
    %39 = arith.negf %38 : vector<1x128xf32>
    %40 = math.exp %39 : vector<1x128xf32>
    %cst_13 = arith.constant 1.000000e+00 : f32
    %41 = vector.broadcast %cst_13 : f32 to vector<1x128xf32>
    %42 = arith.addf %41, %40 : vector<1x128xf32>
    %43 = arith.divf %41, %42 : vector<1x128xf32>
    %44 = math.tanh %38 : vector<1x128xf32>
    %45 = vector.extract_strided_slice %43 {offsets = [0, 0], sizes = [1, 32], strides = [1, 1]} : vector<1x128xf32> to vector<1x32xf32>
    %46 = vector.extract_strided_slice %43 {offsets = [0, 32], sizes = [1, 32], strides = [1, 1]} : vector<1x128xf32> to vector<1x32xf32>
    %47 = vector.extract_strided_slice %44 {offsets = [0, 64], sizes = [1, 32], strides = [1, 1]} : vector<1x128xf32> to vector<1x32xf32>
    %48 = vector.extract_strided_slice %43 {offsets = [0, 96], sizes = [1, 32], strides = [1, 1]} : vector<1x128xf32> to vector<1x32xf32>
    %49 = arith.mulf %46, %27 : vector<1x32xf32>
    %50 = arith.mulf %45, %47 : vector<1x32xf32>
    %51 = arith.addf %49, %50 : vector<1x32xf32>
    %52 = math.tanh %51 : vector<1x32xf32>
    %53 = arith.mulf %48, %52 : vector<1x32xf32>
    %c1_i32 = arith.constant 1 : i32
    %54 = vector.broadcast %c1_i32 : i32 to vector<8x32xi32>
    %55 = arith.cmpi eq, %7, %54 : vector<8x32xi32>
    %56 = vector.shape_cast %53 : vector<1x32xf32> to vector<1x32xf32>
    %57 = vector.broadcast %56 : vector<1x32xf32> to vector<8x32xf32>
    %58 = arith.select %55, %57, %34 : vector<8x32xi1>, vector<8x32xf32>
    %59 = vector.extract_strided_slice %6 {offsets = [2, 0], sizes = [1, 128], strides = [1, 1]} : vector<8x128xf32> to vector<1x128xf32>
    %60 = arith.truncf %53 : vector<1x32xf32> to vector<1x32xbf16>
    %cst_14 = arith.constant dense<0.000000e+00> : vector<1x128xf32>
    %61 = tpu.matmul %60, %0, %cst_14 {dimension_numbers = #tpu.dot_dimension_numbers<[1], [0], [0], [1], [0, 0, 1, 1], [], []>} : vector<1x32xbf16>, vector<32x128xbf16>, vector<1x128xf32> -> vector<1x128xf32>
    %62 = arith.addf %59, %61 : vector<1x128xf32>
    %63 = arith.negf %62 : vector<1x128xf32>
    %64 = math.exp %63 : vector<1x128xf32>
    %cst_15 = arith.constant 1.000000e+00 : f32
    %65 = vector.broadcast %cst_15 : f32 to vector<1x128xf32>
    %66 = arith.addf %65, %64 : vector<1x128xf32>
    %67 = arith.divf %65, %66 : vector<1x128xf32>
    %68 = math.tanh %62 : vector<1x128xf32>
    %69 = vector.extract_strided_slice %67 {offsets = [0, 0], sizes = [1, 32], strides = [1, 1]} : vector<1x128xf32> to vector<1x32xf32>
    %70 = vector.extract_strided_slice %67 {offsets = [0, 32], sizes = [1, 32], strides = [1, 1]} : vector<1x128xf32> to vector<1x32xf32>
    %71 = vector.extract_strided_slice %68 {offsets = [0, 64], sizes = [1, 32], strides = [1, 1]} : vector<1x128xf32> to vector<1x32xf32>
    %72 = vector.extract_strided_slice %67 {offsets = [0, 96], sizes = [1, 32], strides = [1, 1]} : vector<1x128xf32> to vector<1x32xf32>
    %73 = arith.mulf %70, %51 : vector<1x32xf32>
    %74 = arith.mulf %69, %71 : vector<1x32xf32>
    %75 = arith.addf %73, %74 : vector<1x32xf32>
    %76 = math.tanh %75 : vector<1x32xf32>
    %77 = arith.mulf %72, %76 : vector<1x32xf32>
    %c2_i32 = arith.constant 2 : i32
    %78 = vector.broadcast %c2_i32 : i32 to vector<8x32xi32>
    %79 = arith.cmpi eq, %7, %78 : vector<8x32xi32>
    %80 = vector.shape_cast %77 : vector<1x32xf32> to vector<1x32xf32>
    %81 = vector.broadcast %80 : vector<1x32xf32> to vector<8x32xf32>
    %82 = arith.select %79, %81, %58 : vector<8x32xi1>, vector<8x32xf32>
    %83 = vector.extract_strided_slice %6 {offsets = [3, 0], sizes = [1, 128], strides = [1, 1]} : vector<8x128xf32> to vector<1x128xf32>
    %84 = arith.truncf %77 : vector<1x32xf32> to vector<1x32xbf16>
    %cst_16 = arith.constant dense<0.000000e+00> : vector<1x128xf32>
    %85 = tpu.matmul %84, %0, %cst_16 {dimension_numbers = #tpu.dot_dimension_numbers<[1], [0], [0], [1], [0, 0, 1, 1], [], []>} : vector<1x32xbf16>, vector<32x128xbf16>, vector<1x128xf32> -> vector<1x128xf32>
    %86 = arith.addf %83, %85 : vector<1x128xf32>
    %87 = arith.negf %86 : vector<1x128xf32>
    %88 = math.exp %87 : vector<1x128xf32>
    %cst_17 = arith.constant 1.000000e+00 : f32
    %89 = vector.broadcast %cst_17 : f32 to vector<1x128xf32>
    %90 = arith.addf %89, %88 : vector<1x128xf32>
    %91 = arith.divf %89, %90 : vector<1x128xf32>
    %92 = math.tanh %86 : vector<1x128xf32>
    %93 = vector.extract_strided_slice %91 {offsets = [0, 0], sizes = [1, 32], strides = [1, 1]} : vector<1x128xf32> to vector<1x32xf32>
    %94 = vector.extract_strided_slice %91 {offsets = [0, 32], sizes = [1, 32], strides = [1, 1]} : vector<1x128xf32> to vector<1x32xf32>
    %95 = vector.extract_strided_slice %92 {offsets = [0, 64], sizes = [1, 32], strides = [1, 1]} : vector<1x128xf32> to vector<1x32xf32>
    %96 = vector.extract_strided_slice %91 {offsets = [0, 96], sizes = [1, 32], strides = [1, 1]} : vector<1x128xf32> to vector<1x32xf32>
    %97 = arith.mulf %94, %75 : vector<1x32xf32>
    %98 = arith.mulf %93, %95 : vector<1x32xf32>
    %99 = arith.addf %97, %98 : vector<1x32xf32>
    %100 = math.tanh %99 : vector<1x32xf32>
    %101 = arith.mulf %96, %100 : vector<1x32xf32>
    %c3_i32 = arith.constant 3 : i32
    %102 = vector.broadcast %c3_i32 : i32 to vector<8x32xi32>
    %103 = arith.cmpi eq, %7, %102 : vector<8x32xi32>
    %104 = vector.shape_cast %101 : vector<1x32xf32> to vector<1x32xf32>
    %105 = vector.broadcast %104 : vector<1x32xf32> to vector<8x32xf32>
    %106 = arith.select %103, %105, %82 : vector<8x32xi1>, vector<8x32xf32>
    %107 = vector.extract_strided_slice %6 {offsets = [4, 0], sizes = [1, 128], strides = [1, 1]} : vector<8x128xf32> to vector<1x128xf32>
    %108 = arith.truncf %101 : vector<1x32xf32> to vector<1x32xbf16>
    %cst_18 = arith.constant dense<0.000000e+00> : vector<1x128xf32>
    %109 = tpu.matmul %108, %0, %cst_18 {dimension_numbers = #tpu.dot_dimension_numbers<[1], [0], [0], [1], [0, 0, 1, 1], [], []>} : vector<1x32xbf16>, vector<32x128xbf16>, vector<1x128xf32> -> vector<1x128xf32>
    %110 = arith.addf %107, %109 : vector<1x128xf32>
    %111 = arith.negf %110 : vector<1x128xf32>
    %112 = math.exp %111 : vector<1x128xf32>
    %cst_19 = arith.constant 1.000000e+00 : f32
    %113 = vector.broadcast %cst_19 : f32 to vector<1x128xf32>
    %114 = arith.addf %113, %112 : vector<1x128xf32>
    %115 = arith.divf %113, %114 : vector<1x128xf32>
    %116 = math.tanh %110 : vector<1x128xf32>
    %117 = vector.extract_strided_slice %115 {offsets = [0, 0], sizes = [1, 32], strides = [1, 1]} : vector<1x128xf32> to vector<1x32xf32>
    %118 = vector.extract_strided_slice %115 {offsets = [0, 32], sizes = [1, 32], strides = [1, 1]} : vector<1x128xf32> to vector<1x32xf32>
    %119 = vector.extract_strided_slice %116 {offsets = [0, 64], sizes = [1, 32], strides = [1, 1]} : vector<1x128xf32> to vector<1x32xf32>
    %120 = vector.extract_strided_slice %115 {offsets = [0, 96], sizes = [1, 32], strides = [1, 1]} : vector<1x128xf32> to vector<1x32xf32>
    %121 = arith.mulf %118, %99 : vector<1x32xf32>
    %122 = arith.mulf %117, %119 : vector<1x32xf32>
    %123 = arith.addf %121, %122 : vector<1x32xf32>
    %124 = math.tanh %123 : vector<1x32xf32>
    %125 = arith.mulf %120, %124 : vector<1x32xf32>
    %c4_i32 = arith.constant 4 : i32
    %126 = vector.broadcast %c4_i32 : i32 to vector<8x32xi32>
    %127 = arith.cmpi eq, %7, %126 : vector<8x32xi32>
    %128 = vector.shape_cast %125 : vector<1x32xf32> to vector<1x32xf32>
    %129 = vector.broadcast %128 : vector<1x32xf32> to vector<8x32xf32>
    %130 = arith.select %127, %129, %106 : vector<8x32xi1>, vector<8x32xf32>
    %131 = vector.extract_strided_slice %6 {offsets = [5, 0], sizes = [1, 128], strides = [1, 1]} : vector<8x128xf32> to vector<1x128xf32>
    %132 = arith.truncf %125 : vector<1x32xf32> to vector<1x32xbf16>
    %cst_20 = arith.constant dense<0.000000e+00> : vector<1x128xf32>
    %133 = tpu.matmul %132, %0, %cst_20 {dimension_numbers = #tpu.dot_dimension_numbers<[1], [0], [0], [1], [0, 0, 1, 1], [], []>} : vector<1x32xbf16>, vector<32x128xbf16>, vector<1x128xf32> -> vector<1x128xf32>
    %134 = arith.addf %131, %133 : vector<1x128xf32>
    %135 = arith.negf %134 : vector<1x128xf32>
    %136 = math.exp %135 : vector<1x128xf32>
    %cst_21 = arith.constant 1.000000e+00 : f32
    %137 = vector.broadcast %cst_21 : f32 to vector<1x128xf32>
    %138 = arith.addf %137, %136 : vector<1x128xf32>
    %139 = arith.divf %137, %138 : vector<1x128xf32>
    %140 = math.tanh %134 : vector<1x128xf32>
    %141 = vector.extract_strided_slice %139 {offsets = [0, 0], sizes = [1, 32], strides = [1, 1]} : vector<1x128xf32> to vector<1x32xf32>
    %142 = vector.extract_strided_slice %139 {offsets = [0, 32], sizes = [1, 32], strides = [1, 1]} : vector<1x128xf32> to vector<1x32xf32>
    %143 = vector.extract_strided_slice %140 {offsets = [0, 64], sizes = [1, 32], strides = [1, 1]} : vector<1x128xf32> to vector<1x32xf32>
    %144 = vector.extract_strided_slice %139 {offsets = [0, 96], sizes = [1, 32], strides = [1, 1]} : vector<1x128xf32> to vector<1x32xf32>
    %145 = arith.mulf %142, %123 : vector<1x32xf32>
    %146 = arith.mulf %141, %143 : vector<1x32xf32>
    %147 = arith.addf %145, %146 : vector<1x32xf32>
    %148 = math.tanh %147 : vector<1x32xf32>
    %149 = arith.mulf %144, %148 : vector<1x32xf32>
    %c5_i32 = arith.constant 5 : i32
    %150 = vector.broadcast %c5_i32 : i32 to vector<8x32xi32>
    %151 = arith.cmpi eq, %7, %150 : vector<8x32xi32>
    %152 = vector.shape_cast %149 : vector<1x32xf32> to vector<1x32xf32>
    %153 = vector.broadcast %152 : vector<1x32xf32> to vector<8x32xf32>
    %154 = arith.select %151, %153, %130 : vector<8x32xi1>, vector<8x32xf32>
    %155 = vector.extract_strided_slice %6 {offsets = [6, 0], sizes = [1, 128], strides = [1, 1]} : vector<8x128xf32> to vector<1x128xf32>
    %156 = arith.truncf %149 : vector<1x32xf32> to vector<1x32xbf16>
    %cst_22 = arith.constant dense<0.000000e+00> : vector<1x128xf32>
    %157 = tpu.matmul %156, %0, %cst_22 {dimension_numbers = #tpu.dot_dimension_numbers<[1], [0], [0], [1], [0, 0, 1, 1], [], []>} : vector<1x32xbf16>, vector<32x128xbf16>, vector<1x128xf32> -> vector<1x128xf32>
    %158 = arith.addf %155, %157 : vector<1x128xf32>
    %159 = arith.negf %158 : vector<1x128xf32>
    %160 = math.exp %159 : vector<1x128xf32>
    %cst_23 = arith.constant 1.000000e+00 : f32
    %161 = vector.broadcast %cst_23 : f32 to vector<1x128xf32>
    %162 = arith.addf %161, %160 : vector<1x128xf32>
    %163 = arith.divf %161, %162 : vector<1x128xf32>
    %164 = math.tanh %158 : vector<1x128xf32>
    %165 = vector.extract_strided_slice %163 {offsets = [0, 0], sizes = [1, 32], strides = [1, 1]} : vector<1x128xf32> to vector<1x32xf32>
    %166 = vector.extract_strided_slice %163 {offsets = [0, 32], sizes = [1, 32], strides = [1, 1]} : vector<1x128xf32> to vector<1x32xf32>
    %167 = vector.extract_strided_slice %164 {offsets = [0, 64], sizes = [1, 32], strides = [1, 1]} : vector<1x128xf32> to vector<1x32xf32>
    %168 = vector.extract_strided_slice %163 {offsets = [0, 96], sizes = [1, 32], strides = [1, 1]} : vector<1x128xf32> to vector<1x32xf32>
    %169 = arith.mulf %166, %147 : vector<1x32xf32>
    %170 = arith.mulf %165, %167 : vector<1x32xf32>
    %171 = arith.addf %169, %170 : vector<1x32xf32>
    %172 = math.tanh %171 : vector<1x32xf32>
    %173 = arith.mulf %168, %172 : vector<1x32xf32>
    %c6_i32 = arith.constant 6 : i32
    %174 = vector.broadcast %c6_i32 : i32 to vector<8x32xi32>
    %175 = arith.cmpi eq, %7, %174 : vector<8x32xi32>
    %176 = vector.shape_cast %173 : vector<1x32xf32> to vector<1x32xf32>
    %177 = vector.broadcast %176 : vector<1x32xf32> to vector<8x32xf32>
    %178 = arith.select %175, %177, %154 : vector<8x32xi1>, vector<8x32xf32>
    %179 = vector.extract_strided_slice %6 {offsets = [7, 0], sizes = [1, 128], strides = [1, 1]} : vector<8x128xf32> to vector<1x128xf32>
    %180 = arith.truncf %173 : vector<1x32xf32> to vector<1x32xbf16>
    %cst_24 = arith.constant dense<0.000000e+00> : vector<1x128xf32>
    %181 = tpu.matmul %180, %0, %cst_24 {dimension_numbers = #tpu.dot_dimension_numbers<[1], [0], [0], [1], [0, 0, 1, 1], [], []>} : vector<1x32xbf16>, vector<32x128xbf16>, vector<1x128xf32> -> vector<1x128xf32>
    %182 = arith.addf %179, %181 : vector<1x128xf32>
    %183 = arith.negf %182 : vector<1x128xf32>
    %184 = math.exp %183 : vector<1x128xf32>
    %cst_25 = arith.constant 1.000000e+00 : f32
    %185 = vector.broadcast %cst_25 : f32 to vector<1x128xf32>
    %186 = arith.addf %185, %184 : vector<1x128xf32>
    %187 = arith.divf %185, %186 : vector<1x128xf32>
    %188 = math.tanh %182 : vector<1x128xf32>
    %189 = vector.extract_strided_slice %187 {offsets = [0, 0], sizes = [1, 32], strides = [1, 1]} : vector<1x128xf32> to vector<1x32xf32>
    %190 = vector.extract_strided_slice %187 {offsets = [0, 32], sizes = [1, 32], strides = [1, 1]} : vector<1x128xf32> to vector<1x32xf32>
    %191 = vector.extract_strided_slice %188 {offsets = [0, 64], sizes = [1, 32], strides = [1, 1]} : vector<1x128xf32> to vector<1x32xf32>
    %192 = vector.extract_strided_slice %187 {offsets = [0, 96], sizes = [1, 32], strides = [1, 1]} : vector<1x128xf32> to vector<1x32xf32>
    %193 = arith.mulf %190, %171 : vector<1x32xf32>
    %194 = arith.mulf %189, %191 : vector<1x32xf32>
    %195 = arith.addf %193, %194 : vector<1x32xf32>
    %196 = math.tanh %195 : vector<1x32xf32>
    %197 = arith.mulf %192, %196 : vector<1x32xf32>
    %c7_i32 = arith.constant 7 : i32
    %198 = vector.broadcast %c7_i32 : i32 to vector<8x32xi32>
    %199 = arith.cmpi eq, %7, %198 : vector<8x32xi32>
    %200 = vector.shape_cast %197 : vector<1x32xf32> to vector<1x32xf32>
    %201 = vector.broadcast %200 : vector<1x32xf32> to vector<8x32xf32>
    %202 = arith.select %199, %201, %178 : vector<8x32xi1>, vector<8x32xf32>
    %203 = arith.truncf %202 : vector<8x32xf32> to vector<8x32xbf16>
    %c0_26 = arith.constant 0 : index
    %c0_27 = arith.constant 0 : index
    %204 = vector.load %arg4[%c0_26, %c0_27] : memref<32x32xbf16, #tpu.memory_space<vmem>>, vector<32x32xbf16>
    %cst_28 = arith.constant dense<0.000000e+00> : vector<8x32xf32>
    %205 = tpu.matmul %203, %204, %cst_28 {dimension_numbers = #tpu.dot_dimension_numbers<[1], [0], [0], [1], [0, 0, 1, 1], [], []>} : vector<8x32xbf16>, vector<32x32xbf16>, vector<8x32xf32> -> vector<8x32xf32>
    %c0_29 = arith.constant 0 : index
    %c0_30 = arith.constant 0 : index
    %206 = vector.load %arg5[%c0_29, %c0_30] : memref<1x32xf32, #tpu.memory_space<vmem>>, vector<1x32xf32>
    %207 = vector.broadcast %206 : vector<1x32xf32> to vector<8x32xf32>
    %208 = arith.addf %205, %207 : vector<8x32xf32>
    %cst_31 = arith.constant 0.000000e+00 : f32
    %209 = vector.broadcast %cst_31 : f32 to vector<8x32xf32>
    %210 = arith.maximumf %208, %209 : vector<8x32xf32>
    %211 = arith.truncf %210 : vector<8x32xf32> to vector<8x32xbf16>
    %c0_32 = arith.constant 0 : index
    %c0_33 = arith.constant 0 : index
    %212 = vector.load %arg6[%c0_32, %c0_33] : memref<32x2xbf16, #tpu.memory_space<vmem>>, vector<32x2xbf16>
    %cst_34 = arith.constant dense<0.000000e+00> : vector<8x2xf32>
    %213 = tpu.matmul %211, %212, %cst_34 {dimension_numbers = #tpu.dot_dimension_numbers<[1], [0], [0], [1], [0, 0, 1, 1], [], []>} : vector<8x32xbf16>, vector<32x2xbf16>, vector<8x2xf32> -> vector<8x2xf32>
    %c0_35 = arith.constant 0 : index
    %c0_36 = arith.constant 0 : index
    %214 = vector.load %arg7[%c0_35, %c0_36] : memref<1x2xf32, #tpu.memory_space<vmem>>, vector<1x2xf32>
    %215 = vector.broadcast %214 : vector<1x2xf32> to vector<8x2xf32>
    %216 = arith.addf %213, %215 : vector<8x2xf32>
    %c0_37 = arith.constant 0 : index
    %c0_38 = arith.constant 0 : index
    %217 = vector.load %arg8[%c0_37, %c0_38] : memref<8x2xf32, #tpu.memory_space<vmem>>, vector<8x2xf32>
    tpu.vector_store %arg8[%c0_37, %c0_38], %216 {strides = array<i32>} : memref<8x2xf32, #tpu.memory_space<vmem>>, vector<8x2xf32>,
    return
  }
}

</mosaic_0001>

<bundles_post_ra>
// kernel: tpu_custom_call.1
= control target key start
LH: loop header
LB: loop body
LE: loop exit
PB: predicated region body
PF: predicated region fallthrough
CT: control target
= control target key end

     0   :  { %13 = vsyncpa [#allocation3], 0  ;;  %s1182_s27 = smov [#allocation2]   ;;  %s1401_s0 = inlined_call_operand.vmem [shape: bf16[8,4], index: 0, kind: input, shape index: {}]   ;;  %s1402_s1 = inlined_call_operand.vmem [shape: bf16[4,128], index: 1, kind: input, shape index: {}]   ;;  %s1403_s2 = inlined_call_operand.vmem [shape: bf16[32,128], index: 2, kind: input, shape index: {}]   ;;  %s1404_s3 = inlined_call_operand.vmem [shape: f32[1,128], index: 3, kind: input, shape index: {}]   ;;  %s1405_s4 = inlined_call_operand.hbm [shape: bf16[32,32], index: 4, kind: input, shape index: {}]   ;;  %s1406_s5 = inlined_call_operand.vmem [shape: f32[1,32], index: 5, kind: input, shape index: {}]   ;;  %s1407_s6 = inlined_call_operand.vmem [shape: bf16[32,2], index: 6, kind: input, shape index: {}]   ;;  %s1408_s7 = inlined_call_operand.vmem [shape: f32[1,2], index: 7, kind: input, shape index: {}]   ;;  %s1409_s8 = inlined_call_operand.vmem [shape: f32[8,2], index: 8, kind: output, shape index: {}]  }
   0x1   :  { %s27_s28 = sshll.u32 %s1182_s27, 4  ;;  %s28_s28 = int_to_ptr.vmem [resolvable:$true] %s27_s28 }
   0x2   :  { %s1168_s29 = scalar_lea.vmem %s28_s28, 256  ;;  %p1173_p1 = scmp.lt.s32.totalorder %s28_s28, %s28_s28 }
   0x3   :  { %p1169_p0 = scmp.ne.s32.totalorder %s28_s28, %s1168_s29  ;;  %p1174_p2 = scmp.lt.s32.totalorder %s1168_s29, %s1168_s29 }
   0x5   :  { %p1175_p3 = por %p1174_p2, %p1173_p1 }
   0x7   :  { %p1176_p4 = pnand %p1175_p3, %p1169_p0 }
   0x9   :  { %1179 = shalt.err (!%p1176_p4)
}
   0xa   :  { %s1183_s30 = smov 64   ;;  %s1184_s9 = smov 4  }
   0xb   :  { %33 = dma.hbm_to_vmem [thread:$0]  %s1405_s4, 256, %s28_s28, [#allocation3], %s1183_s30, %s1183_s30, %s1184_s9  }
   0xc   :  { %1180 = dma.done.wait [#allocation3], 256  }
   0xd   :  { %1181 = vsyncadd [#allocation3], 4294967040  ;;  %v1185_v0 = vmov 0.0   ;;  %vm1186_vm0 = vmmov 0   ;;  %vm61_vm1 = vcmask 1041408   ;;  %v1251_v3 = vld [vmem:[%s1403_s2 + $0x8] sm:$0xff]   ;;  %v105_v51 = vlaneseq }
   0xe   :  { %997 = vmatprep.subr.bf16.mxu0 %v1185_v0  ;;  %1003 = vmatprep.subr.bf16.mxu1 %v1185_v0  ;;  %v50_v1 = vld [vmem:[%s1402_s1] sm:$0x3]  ;;  %vm57_vm2 = vcmask 31744   ;;  %v1187_v6 = vmov 0   ;;  %vm119_vm3 = vcmask 261120   ;;  %vm931_vm12 = vcmask 15360  }
   0xf   :  { %999 = vmatprep.mubr.msk.bf16.mxu0 %vm1186_vm0, %v1185_v0  ;;  %1007 = vmatprep.mubr.msk.bf16.mxu1 %vm1186_vm0, %v1185_v0  ;;  %v63_v2 = vsel %vm61_vm1, %v50_v1, 0  ;;  %v49_v4 = vld [vmem:[%s1401_s0] sm:$0xf]  ;;  %v1299_v52 = vshrl.u32 %v105_v51, 7 }
  0x10   :  { %998 = vmatpush3.bf16.msra.mxu0 %v63_v2  ;;  %v1259_v5 = vld [vmem:[%s1403_s2] sm:$0xff]   ;;  %1004 = vmatpush3.bf16.msra.mxu1 %v1251_v3  ;;  %s1188_s2 = smov 32  }
  0x11   :  { %1011 = vmatprep.subr.bf16.mxu0 %v1185_v0  ;;  %1005 = vmatprep.subr.bf16.mxu1 %v1185_v0  ;;  %v938_v7 = vld [vmem:[%s1404_s3] ss:$0 sm:$0xff]  ;;  %v191_v53 = vsub.s32 0, %v1299_v52  ;;  %v275_v54 = vsub.s32 1, %v1299_v52  ;;  %vm188_vm4 = vcmp.eq.s32.totalorder %v1299_v52, 0  ;;  %vm272_vm5 = vcmp.eq.s32.totalorder %v1299_v52, 1 }
  0x12   :  { %vm358_vm6 = vcmp.eq.s32.totalorder %v1299_v52, 2  ;;  %vm443_vm7 = vcmp.eq.s32.totalorder %v1299_v52, 3  ;;  %vm530_vm8 = vcmp.eq.s32.totalorder %v1299_v52, 4  ;;  %vm615_vm9 = vcmp.eq.s32.totalorder %v1299_v52, 5 }
  0x13   :  { %1000 = vmatmul.mubr.msk.bf16.vlgmr.msra.gmra.mxu0 %vm57_vm2, %v49_v4  ;;  %vm702_vm10 = vcmp.eq.s32.totalorder %v1299_v52, 6  ;;  %vm787_vm11 = vcmp.eq.s32.totalorder %v1299_v52, 7 }
  0x14   :  { %1012 = vmatpush3.bf16.msra.mxu0 %v1251_v3  ;;  %1015 = vmatprep.mubr.msk.bf16.mxu0 %vm1186_vm0, %v1185_v0 }
  0x15   :  { %1006 = vmatpush3.bf16.msra.mxu1 %v1259_v5  ;;  %1013 = vmatprep.subr.bf16.mxu0 %v1185_v0 }
  0x16   :  { %1019 = vmatprep.subr.bf16.mxu1 %v1185_v0 }
  0x18   :  { %1008 = vmatmul.mubr.bf16.vlgmr.msra.gmra.mxu1 %v1187_v6  ;;  %1014 = vmatpush3.bf16.msra.mxu0 %v1259_v5 }
  0x19   :  { %1020 = vmatpush3.bf16.msra.mxu1 %v1251_v3  ;;  %1023 = vmatprep.mubr.msk.bf16.mxu1 %vm1186_vm0, %v1185_v0 }
  0x1a   :  { %1021 = vmatprep.subr.bf16.mxu1 %v1185_v0  ;;  %1027 = vmatprep.subr.bf16.mxu0 %v1185_v0 }
  0x1d   :  { %1022 = vmatpush3.bf16.msra.mxu1 %v1259_v5 }
  0x1e   :  { %1035 = vmatprep.subr.bf16.mxu1 %v1185_v0 }
  0xd3   :  { %v99_v8 = vpop.f32.mrf.mxu0 }
  0xd4   :  { %v1281_v9 = vadd.f32 %v938_v7, %v99_v8 }
  0xd5   :  { %v1001_v10 = vpop.f32.mrf.mxu0 }
  0xd7   :  { %v102_v11 = vpop.f32.mrf.mxu0 }
  0xd8   :  { %v157_v12 = vpop.f32.mrf.mxu1 }
  0xd9   :  { %v163_v13 = vadd.f32 %v157_v12, %v1281_v9  ;;  %v1002_v14 = vpop.f32.mrf.mxu0 }
  0xda   :  { %v1009_v15 = vpop.f32.mrf.mxu1 }
  0xdb   :  { %1096 = vtanh.f32 %v163_v13  ;;  %v942_v19 = vmul.f32 -1.442695, %v163_v13 }
  0xdc   :  { %v160_v16 = vpop.f32.mrf.mxu1 }
  0xdd   :  { %1098 = vpow2.f32 %v942_v19 }
  0xde   :  { %v1010_v17 = vpop.f32.mrf.mxu1 }
  0xe8   :  { %v1097_v18 = vpop.eup %1096 }
  0xe9   :  { %173 = vrot.lane.b32.xlu0 %v1097_v18, %s1183_s30 }
  0xea   :  { %v1099_v20 = vpop.eup %1098 }
  0xeb   :  { %v167_v21 = vadd.f32 1.0, %v1099_v20 }
  0xed   :  { %1100 = vrcp.f32 %v167_v21 }
  0xfa   :  { %v1101_v22 = vpop.eup %1100 }
  0xfb   :  { %v171_v25 = vmul.f32 0.0, %v1101_v22 }
 0x15b   :  { %v174_v23 = vpop.permute.xlu0 %173 }
 0x15c   :  { %v176_v24 = vmul.f32 %v1101_v22, %v174_v23 }
 0x15e   :  { %178 = vrot.lane.b32.xlu0 %v176_v24, %s1188_s2 }
 0x1d0   :  { %v179_v26 = vpop.permute.xlu0 %178 }
 0x1d1   :  { %v181_v27 = vadd.f32 %v179_v26, %v171_v25 }
 0x1d3   :  { %1102 = vtanh.f32 %v181_v27  ;;  %v253_v46 = vrot.slane %v181_v27, 7 }
 0x1e0   :  { %v1103_v28 = vpop.eup %1102 }
 0x1e1   :  { %184 = vrot.lane.b32.xlu1 %v1103_v28, %s1183_s30 }
 0x253   :  { %v185_v29 = vpop.permute.xlu1 %184 }
 0x254   :  { %v187_v30 = vmul.f32 %v1101_v22, %v185_v29  ;;  %v361_v22 = vsub.s32 2, %v1299_v52 }
 0x256   :  { %v194_v31 = vpack.c.bf16 %v187_v30, %v187_v30  ;;  %v192_v55 = vrot.slane %v187_v30, %v191_v53 }
 0x258   :  { %196 = vrot.lane.b32.xlu1 %v194_v31, %s1188_s2  ;;  %v193_v60 = vsel %vm188_vm4, %v192_v55, 0.0 }
 0x2ca   :  { %v197_v32 = vpop.permute.xlu1 %196 }
 0x2cb   :  { %1016 = vmatmul.mubr.msk.bf16.vlgmr.msra.gmra.mxu0 %vm119_vm3, %v197_v32 }
 0x2cc   :  { %1028 = vmatpush3.bf16.msra.mxu0 %v1251_v3  ;;  %1031 = vmatprep.mubr.msk.bf16.mxu0 %vm1186_vm0, %v1185_v0 }
 0x2cd   :  { %1029 = vmatprep.subr.bf16.mxu0 %v1185_v0 }
 0x2d0   :  { %1030 = vmatpush3.bf16.msra.mxu0 %v1259_v5 }
 0x2d1   :  { %1043 = vmatprep.subr.bf16.mxu0 %v1185_v0 }
 0x38b   :  { %v235_v33 = vpop.f32.mrf.mxu0 }
 0x38c   :  { %v242_v34 = vrot.slane %v235_v33, 7 }
 0x38d   :  { %v1017_v35 = vpop.f32.mrf.mxu0 }
 0x38e   :  { %v244_v36 = vadd.f32 %v242_v34, %v1281_v9 }
 0x38f   :  { %v238_v37 = vpop.f32.mrf.mxu0 }
 0x390   :  { %1104 = vtanh.f32 %v244_v36  ;;  %v944_v40 = vmul.f32 -1.442695, %v244_v36 }
 0x391   :  { %v1018_v38 = vpop.f32.mrf.mxu0 }
 0x392   :  { %1106 = vpow2.f32 %v944_v40 }
 0x39d   :  { %v1105_v39 = vpop.eup %1104 }
 0x39e   :  { %257 = vrot.lane.b32.xlu0 %v1105_v39, %s1183_s30 }
 0x39f   :  { %v1107_v41 = vpop.eup %1106 }
 0x3a0   :  { %v248_v42 = vadd.f32 1.0, %v1107_v41 }
 0x3a2   :  { %1108 = vrcp.f32 %v248_v42 }
 0x3af   :  { %v1109_v43 = vpop.eup %1108 }
 0x3b0   :  { %v255_v47 = vmul.f32 %v1109_v43, %v253_v46 }
 0x410   :  { %v258_v44 = vpop.permute.xlu0 %257 }
 0x411   :  { %v260_v45 = vmul.f32 %v1109_v43, %v258_v44 }
 0x413   :  { %262 = vrot.lane.b32.xlu1 %v260_v45, %s1188_s2 }
 0x485   :  { %v263_v48 = vpop.permute.xlu1 %262 }
 0x486   :  { %v265_v49 = vadd.f32 %v263_v48, %v255_v47  ;;  %v446_v48 = vsub.s32 3, %v1299_v52 }
 0x488   :  { %1110 = vtanh.f32 %v265_v49  ;;  %v339_v17 = vrot.slane %v265_v49, 7 }
 0x495   :  { %v1111_v50 = vpop.eup %1110 }
 0x496   :  { %268 = vrot.lane.b32.xlu0 %v1111_v50, %s1183_s30 }
 0x508   :  { %v269_v56 = vpop.permute.xlu0 %268 }
 0x509   :  { %v271_v57 = vmul.f32 %v1109_v43, %v269_v56 }
 0x50b   :  { %v276_v58 = vrot.slane %v271_v57, %v275_v54  ;;  %v278_v59 = vpack.c.bf16 %v271_v57, %v271_v57 }
 0x50d   :  { %v277_v61 = vsel %vm272_vm5, %v276_v58, %v193_v60  ;;  %v280_v62 = vshrl.u32 %v278_v59, 16 }
 0x50f   :  { %282 = vrot.lane.b32.xlu1 %v280_v62, %s1188_s2 }
 0x581   :  { %v283_v63 = vpop.permute.xlu1 %282 }
 0x582   :  { %1024 = vmatmul.mubr.msk.bf16.vlgmr.msra.gmra.mxu1 %vm119_vm3, %v283_v63 }
 0x583   :  { %1036 = vmatpush3.bf16.msra.mxu1 %v1251_v3  ;;  %1039 = vmatprep.mubr.msk.bf16.mxu1 %vm1186_vm0, %v1185_v0 }
 0x584   :  { %1037 = vmatprep.subr.bf16.mxu1 %v1185_v0 }
 0x587   :  { %1038 = vmatpush3.bf16.msra.mxu1 %v1259_v5 }
 0x588   :  { %1051 = vmatprep.subr.bf16.mxu1 %v1185_v0 }
 0x642   :  { %v321_v1 = vpop.f32.mrf.mxu1 }
 0x643   :  { %v328_v2 = vrot.slane %v321_v1, 6 }
 0x644   :  { %v1025_v4 = vpop.f32.mrf.mxu1 }
 0x645   :  { %v330_v6 = vadd.f32 %v328_v2, %v1281_v9 }
 0x646   :  { %v324_v7 = vpop.f32.mrf.mxu1 }
 0x647   :  { %1112 = vtanh.f32 %v330_v6  ;;  %v946_v11 = vmul.f32 -1.442695, %v330_v6 }
 0x648   :  { %v1026_v8 = vpop.f32.mrf.mxu1 }
 0x649   :  { %1114 = vpow2.f32 %v946_v11 }
 0x654   :  { %v1113_v10 = vpop.eup %1112 }
 0x655   :  { %343 = vrot.lane.b32.xlu0 %v1113_v10, %s1183_s30 }
 0x656   :  { %v1115_v12 = vpop.eup %1114 }
 0x657   :  { %v334_v13 = vadd.f32 1.0, %v1115_v12 }
 0x659   :  { %1116 = vrcp.f32 %v334_v13 }
 0x666   :  { %v1117_v14 = vpop.eup %1116 }
 0x667   :  { %v341_v18 = vmul.f32 %v1117_v14, %v339_v17 }
 0x6c7   :  { %v344_v15 = vpop.permute.xlu0 %343 }
 0x6c8   :  { %v346_v16 = vmul.f32 %v1117_v14, %v344_v15 }
 0x6ca   :  { %348 = vrot.lane.b32.xlu1 %v346_v16, %s1188_s2  ;;  %v533_v16 = vsub.s32 4, %v1299_v52 }
 0x73c   :  { %v349_v19 = vpop.permute.xlu1 %348 }
 0x73d   :  { %v351_v20 = vadd.f32 %v349_v19, %v341_v18 }
 0x73f   :  { %1118 = vtanh.f32 %v351_v20  ;;  %v424_v43 = vrot.slane %v351_v20, 7 }
 0x74c   :  { %v1119_v21 = vpop.eup %1118 }
 0x74d   :  { %354 = vrot.lane.b32.xlu0 %v1119_v21, %s1183_s30 }
 0x7bf   :  { %v355_v23 = vpop.permute.xlu0 %354 }
 0x7c0   :  { %v357_v24 = vmul.f32 %v1117_v14, %v355_v23 }
 0x7c2   :  { %v362_v25 = vrot.slane %v357_v24, %v361_v22  ;;  %v364_v26 = vpack.c.bf16 %v357_v24, %v357_v24 }
 0x7c4   :  { %v363_v27 = vsel %vm358_vm6, %v362_v25, %v277_v61  ;;  %v366_v28 = vrot.slane %v364_v26, 1 }
 0x7c6   :  { %367 = vrot.lane.b32.xlu1 %v366_v28, %s1188_s2 }
 0x838   :  { %v368_v29 = vpop.permute.xlu1 %367 }
 0x839   :  { %1032 = vmatmul.mubr.msk.bf16.vlgmr.msra.gmra.mxu0 %vm119_vm3, %v368_v29 }
 0x83a   :  { %1044 = vmatpush3.bf16.msra.mxu0 %v1251_v3  ;;  %1047 = vmatprep.mubr.msk.bf16.mxu0 %vm1186_vm0, %v1185_v0 }
 0x83b   :  { %1045 = vmatprep.subr.bf16.mxu0 %v1185_v0 }
 0x83e   :  { %1046 = vmatpush3.bf16.msra.mxu0 %v1259_v5 }
 0x83f   :  { %1059 = vmatprep.subr.bf16.mxu0 %v1185_v0 }
 0x8f9   :  { %v406_v30 = vpop.f32.mrf.mxu0 }
 0x8fa   :  { %v413_v31 = vrot.slane %v406_v30, 5 }
 0x8fb   :  { %v1033_v32 = vpop.f32.mrf.mxu0 }
 0x8fc   :  { %v415_v33 = vadd.f32 %v413_v31, %v1281_v9 }
 0x8fd   :  { %v409_v34 = vpop.f32.mrf.mxu0 }
 0x8fe   :  { %1120 = vtanh.f32 %v415_v33  ;;  %v948_v37 = vmul.f32 -1.442695, %v415_v33 }
 0x8ff   :  { %v1034_v35 = vpop.f32.mrf.mxu0 }
 0x900   :  { %1122 = vpow2.f32 %v948_v37 }
 0x90b   :  { %v1121_v36 = vpop.eup %1120 }
 0x90c   :  { %428 = vrot.lane.b32.xlu0 %v1121_v36, %s1183_s30 }
 0x90d   :  { %v1123_v38 = vpop.eup %1122 }
 0x90e   :  { %v419_v39 = vadd.f32 1.0, %v1123_v38 }
 0x910   :  { %1124 = vrcp.f32 %v419_v39 }
 0x91d   :  { %v1125_v40 = vpop.eup %1124 }
 0x91e   :  { %v426_v44 = vmul.f32 %v1125_v40, %v424_v43 }
 0x97e   :  { %v429_v41 = vpop.permute.xlu0 %428 }
 0x97f   :  { %v431_v42 = vmul.f32 %v1125_v40, %v429_v41 }
 0x981   :  { %433 = vrot.lane.b32.xlu1 %v431_v42, %s1188_s2 }
 0x9f3   :  { %v434_v45 = vpop.permute.xlu1 %433 }
 0x9f4   :  { %v436_v46 = vadd.f32 %v434_v45, %v426_v44 }
 0x9f6   :  { %1126 = vtanh.f32 %v436_v46  ;;  %v511_v11 = vrot.slane %v436_v46, 7 }
 0xa03   :  { %v1127_v47 = vpop.eup %1126 }
 0xa04   :  { %439 = vrot.lane.b32.xlu0 %v1127_v47, %s1183_s30 }
 0xa76   :  { %v440_v49 = vpop.permute.xlu0 %439 }
 0xa77   :  { %v442_v50 = vmul.f32 %v1125_v40, %v440_v49  ;;  %v618_v40 = vsub.s32 5, %v1299_v52 }
 0xa79   :  { %v447_v51 = vrot.slane %v442_v50, %v446_v48  ;;  %v449_v53 = vpack.c.bf16 %v442_v50, %v442_v50 }
 0xa7b   :  { %v448_v54 = vsel %vm443_vm7, %v447_v51, %v363_v27  ;;  %v451_v55 = vshrl.u32 %v449_v53, 16 }
 0xa7d   :  { %v453_v56 = vrot.slane %v451_v55, 1 }
 0xa7f   :  { %454 = vrot.lane.b32.xlu1 %v453_v56, %s1188_s2 }
 0xaf1   :  { %v455_v57 = vpop.permute.xlu1 %454 }
 0xaf2   :  { %1040 = vmatmul.mubr.msk.bf16.vlgmr.msra.gmra.mxu1 %vm119_vm3, %v455_v57 }
 0xaf3   :  { %1052 = vmatpush3.bf16.msra.mxu1 %v1251_v3  ;;  %1055 = vmatprep.mubr.msk.bf16.mxu1 %vm1186_vm0, %v1185_v0 }
 0xaf4   :  { %1053 = vmatprep.subr.bf16.mxu1 %v1185_v0 }
 0xaf7   :  { %1054 = vmatpush3.bf16.msra.mxu1 %v1259_v5 }
 0xaf8   :  { %1067 = vmatprep.subr.bf16.mxu1 %v1185_v0 }
 0xbb2   :  { %v493_v58 = vpop.f32.mrf.mxu1 }
 0xbb3   :  { %v500_v59 = vrot.slane %v493_v58, 4 }
 0xbb4   :  { %v1041_v60 = vpop.f32.mrf.mxu1 }
 0xbb5   :  { %v502_v61 = vadd.f32 %v500_v59, %v1281_v9 }
 0xbb6   :  { %v496_v62 = vpop.f32.mrf.mxu1 }
 0xbb7   :  { %1128 = vtanh.f32 %v502_v61  ;;  %v950_v2 = vmul.f32 -1.442695, %v502_v61 }
 0xbb8   :  { %v1042_v63 = vpop.f32.mrf.mxu1 }
 0xbb9   :  { %1130 = vpow2.f32 %v950_v2 }
 0xbc4   :  { %v1129_v1 = vpop.eup %1128 }
 0xbc5   :  { %515 = vrot.lane.b32.xlu0 %v1129_v1, %s1183_s30 }
 0xbc6   :  { %v1131_v4 = vpop.eup %1130 }
 0xbc7   :  { %v506_v6 = vadd.f32 1.0, %v1131_v4 }
 0xbc9   :  { %1132 = vrcp.f32 %v506_v6 }
 0xbd6   :  { %v1133_v7 = vpop.eup %1132 }
 0xbd7   :  { %v513_v12 = vmul.f32 %v1133_v7, %v511_v11 }
 0xc37   :  { %v516_v8 = vpop.permute.xlu0 %515 }
 0xc38   :  { %v518_v10 = vmul.f32 %v1133_v7, %v516_v8 }
 0xc3a   :  { %520 = vrot.lane.b32.xlu1 %v518_v10, %s1188_s2 }
 0xcac   :  { %v521_v13 = vpop.permute.xlu1 %520 }
 0xcad   :  { %v523_v14 = vadd.f32 %v521_v13, %v513_v12 }
 0xcaf   :  { %1134 = vtanh.f32 %v523_v14  ;;  %v596_v35 = vrot.slane %v523_v14, 7 }
 0xcbc   :  { %v1135_v15 = vpop.eup %1134 }
 0xcbd   :  { %526 = vrot.lane.b32.xlu0 %v1135_v15, %s1183_s30 }
 0xd2f   :  { %v527_v17 = vpop.permute.xlu0 %526 }
 0xd30   :  { %v529_v18 = vmul.f32 %v1133_v7, %v527_v17  ;;  %v705_v7 = vsub.s32 6, %v1299_v52 }
 0xd32   :  { %v534_v19 = vrot.slane %v529_v18, %v533_v16  ;;  %v536_v20 = vpack.c.bf16 %v529_v18, %v529_v18 }
 0xd34   :  { %v535_v21 = vsel %vm530_vm8, %v534_v19, %v448_v54  ;;  %v538_v22 = vrot.slane %v536_v20, 2 }
 0xd36   :  { %539 = vrot.lane.b32.xlu1 %v538_v22, %s1188_s2 }
 0xda8   :  { %v540_v23 = vpop.permute.xlu1 %539 }
 0xda9   :  { %1048 = vmatmul.mubr.msk.bf16.vlgmr.msra.gmra.mxu0 %vm119_vm3, %v540_v23 }
 0xdaa   :  { %1060 = vmatpush3.bf16.msra.mxu0 %v1251_v3  ;;  %1063 = vmatprep.mubr.msk.bf16.mxu0 %vm1186_vm0, %v1185_v0 }
 0xdab   :  { %1061 = vmatprep.subr.bf16.mxu0 %v1185_v0 }
 0xdae   :  { %1062 = vmatpush3.bf16.msra.mxu0 %v1259_v5 }
 0xdaf   :  { %1075 = vmatprep.subr.bf16.mxu0 %v1185_v0 }
 0xe69   :  { %v578_v24 = vpop.f32.mrf.mxu0 }
 0xe6a   :  { %v585_v25 = vrot.slane %v578_v24, 3 }
 0xe6b   :  { %v1049_v26 = vpop.f32.mrf.mxu0 }
 0xe6c   :  { %v587_v27 = vadd.f32 %v585_v25, %v1281_v9 }
 0xe6d   :  { %v581_v28 = vpop.f32.mrf.mxu0 }
 0xe6e   :  { %1136 = vtanh.f32 %v587_v27  ;;  %v952_v3 = vmul.f32 -1.442695, %v587_v27 }
 0xe6f   :  { %v1050_v29 = vpop.f32.mrf.mxu0 }
 0xe70   :  { %1138 = vpow2.f32 %v952_v3 }
 0xe7b   :  { %v1137_v30 = vpop.eup %1136 }
 0xe7c   :  { %600 = vrot.lane.b32.xlu0 %v1137_v30, %s1183_s30 }
 0xe7d   :  { %v1139_v31 = vpop.eup %1138 }
 0xe7e   :  { %v591_v32 = vadd.f32 1.0, %v1139_v31  ;;  %v1092_v31 = vld [vmem:[#allocation2 + $0x8] sm:$0xff]  }
 0xe80   :  { %1140 = vrcp.f32 %v591_v32  ;;  %v1093_v32 = vld [vmem:[#allocation2] sm:$0xff]  }
 0xe8d   :  { %v1141_v33 = vpop.eup %1140 }
 0xe8e   :  { %v598_v36 = vmul.f32 %v1141_v33, %v596_v35 }
 0xeee   :  { %v601_v5 = vpop.permute.xlu0 %600 }
 0xeef   :  { %v603_v34 = vmul.f32 %v1141_v33, %v601_v5  ;;  %v1094_v5 = vld [vmem:[%s1407_s6 + $0x8] sm:$0xff]  }
 0xef1   :  { %605 = vrot.lane.b32.xlu1 %v603_v34, %s1188_s2  ;;  %v790_v34 = vsub.s32 7, %v1299_v52 }
 0xf63   :  { %v606_v37 = vpop.permute.xlu1 %605 }
 0xf64   :  { %v608_v38 = vadd.f32 %v606_v37, %v598_v36 }
 0xf66   :  { %1142 = vtanh.f32 %v608_v38  ;;  %v683_v63 = vrot.slane %v608_v38, 7 }
 0xf73   :  { %v1143_v39 = vpop.eup %1142 }
 0xf74   :  { %611 = vrot.lane.b32.xlu0 %v1143_v39, %s1183_s30 }
 0xfe6   :  { %v612_v41 = vpop.permute.xlu0 %611 }
 0xfe7   :  { %v614_v42 = vmul.f32 %v1141_v33, %v612_v41  ;;  %v1095_v41 = vld [vmem:[%s1407_s6] sm:$0xff]  }
 0xfe9   :  { %v619_v43 = vrot.slane %v614_v42, %v618_v40  ;;  %v621_v44 = vpack.c.bf16 %v614_v42, %v614_v42 }
 0xfeb   :  { %v620_v45 = vsel %vm615_vm9, %v619_v43, %v535_v21  ;;  %v623_v46 = vshrl.u32 %v621_v44, 16 }
 0xfed   :  { %v625_v47 = vrot.slane %v623_v46, 2 }
 0xfef   :  { %626 = vrot.lane.b32.xlu1 %v625_v47, %s1188_s2 }
0x1061   :  { %v627_v48 = vpop.permute.xlu1 %626 }
0x1062   :  { %1056 = vmatmul.mubr.msk.bf16.vlgmr.msra.gmra.mxu1 %vm119_vm3, %v627_v48  ;;  %v961_v48 = vld [vmem:[%s1408_s7] ss:$0 sm:$0xff] }
0x1063   :  { %1071 = vmatprep.mubr.msk.bf16.mxu1 %vm1186_vm0, %v1185_v0  ;;  %1068 = vmatpush3.bf16.msra.mxu1 %v1092_v31 }
0x1064   :  { %1069 = vmatprep.subr.bf16.mxu1 %v1185_v0 }
0x1067   :  { %1070 = vmatpush3.bf16.msra.mxu1 %v1093_v32 }
0x1122   :  { %v665_v49 = vpop.f32.mrf.mxu1 }
0x1123   :  { %v672_v50 = vrot.slane %v665_v49, 2 }
0x1124   :  { %v1057_v51 = vpop.f32.mrf.mxu1 }
0x1125   :  { %v674_v53 = vadd.f32 %v672_v50, %v1281_v9 }
0x1126   :  { %v668_v54 = vpop.f32.mrf.mxu1 }
0x1127   :  { %1144 = vtanh.f32 %v674_v53  ;;  %v954_v57 = vmul.f32 -1.442695, %v674_v53 }
0x1128   :  { %v1058_v55 = vpop.f32.mrf.mxu1 }
0x1129   :  { %1146 = vpow2.f32 %v954_v57 }
0x1134   :  { %v1145_v56 = vpop.eup %1144 }
0x1135   :  { %687 = vrot.lane.b32.xlu0 %v1145_v56, %s1183_s30 }
0x1136   :  { %v1147_v58 = vpop.eup %1146 }
0x1137   :  { %v678_v59 = vadd.f32 1.0, %v1147_v58 }
0x1139   :  { %1148 = vrcp.f32 %v678_v59 }
0x1146   :  { %v1149_v60 = vpop.eup %1148 }
0x1147   :  { %v685_v1 = vmul.f32 %v1149_v60, %v683_v63 }
0x11a7   :  { %v688_v61 = vpop.permute.xlu0 %687 }
0x11a8   :  { %v690_v62 = vmul.f32 %v1149_v60, %v688_v61 }
0x11aa   :  { %692 = vrot.lane.b32.xlu1 %v690_v62, %s1188_s2 }
0x121c   :  { %v693_v2 = vpop.permute.xlu1 %692 }
0x121d   :  { %v695_v4 = vadd.f32 %v693_v2, %v685_v1 }
0x121f   :  { %1150 = vtanh.f32 %v695_v4  ;;  %v768_v29 = vrot.slane %v695_v4, 7 }
0x122c   :  { %v1151_v6 = vpop.eup %1150 }
0x122d   :  { %698 = vrot.lane.b32.xlu0 %v1151_v6, %s1183_s30 }
0x129f   :  { %v699_v8 = vpop.permute.xlu0 %698 }
0x12a0   :  { %v701_v10 = vmul.f32 %v1149_v60, %v699_v8 }
0x12a2   :  { %v706_v11 = vrot.slane %v701_v10, %v705_v7  ;;  %v708_v12 = vpack.c.bf16 %v701_v10, %v701_v10 }
0x12a4   :  { %v710_v13 = vrot.slane %v708_v12, 3  ;;  %v707_v14 = vsel %vm702_vm10, %v706_v11, %v620_v45 }
0x12a6   :  { %711 = vrot.lane.b32.xlu1 %v710_v13, %s1188_s2 }
0x1318   :  { %v712_v15 = vpop.permute.xlu1 %711 }
0x1319   :  { %1064 = vmatmul.mubr.msk.bf16.vlgmr.msra.gmra.mxu0 %vm119_vm3, %v712_v15 }
0x131a   :  { %1079 = vmatprep.mubr.msk.bf16.mxu0 %vm1186_vm0, %v1185_v0  ;;  %1076 = vmatpush3.bf16.msra.mxu0 %v1094_v5 }
0x131b   :  { %1077 = vmatprep.subr.bf16.mxu0 %v1185_v0  ;;  %v957_v0 = vld [vmem:[%s1406_s5] ss:$0 sm:$0xff] }
0x131e   :  { %1078 = vmatpush3.bf16.msra.mxu0 %v1095_v41 }
0x13d9   :  { %v750_v16 = vpop.f32.mrf.mxu0 }
0x13da   :  { %v757_v17 = vrot.slane %v750_v16, 1 }
0x13db   :  { %v1065_v18 = vpop.f32.mrf.mxu0 }
0x13dc   :  { %v759_v19 = vadd.f32 %v757_v17, %v1281_v9 }
0x13dd   :  { %v753_v20 = vpop.f32.mrf.mxu0 }
0x13de   :  { %1152 = vtanh.f32 %v759_v19  ;;  %v956_v23 = vmul.f32 -1.442695, %v759_v19 }
0x13df   :  { %v1066_v21 = vpop.f32.mrf.mxu0 }
0x13e0   :  { %1154 = vpow2.f32 %v956_v23 }
0x13eb   :  { %v1153_v22 = vpop.eup %1152 }
0x13ec   :  { %772 = vrot.lane.b32.xlu0 %v1153_v22, %s1183_s30 }
0x13ed   :  { %v1155_v24 = vpop.eup %1154 }
0x13ee   :  { %v763_v25 = vadd.f32 1.0, %v1155_v24 }
0x13f0   :  { %1156 = vrcp.f32 %v763_v25 }
0x13fd   :  { %v1157_v26 = vpop.eup %1156 }
0x13fe   :  { %v770_v30 = vmul.f32 %v1157_v26, %v768_v29 }
0x145e   :  { %v773_v27 = vpop.permute.xlu0 %772 }
0x145f   :  { %v775_v28 = vmul.f32 %v1157_v26, %v773_v27 }
0x1461   :  { %777 = vrot.lane.b32.xlu1 %v775_v28, %s1188_s2 }
0x14d3   :  { %v778_v3 = vpop.permute.xlu1 %777 }
0x14d4   :  { %v780_v9 = vadd.f32 %v778_v3, %v770_v30 }
0x14d6   :  { %1158 = vtanh.f32 %v780_v9 }
0x14e3   :  { %v1159_v33 = vpop.eup %1158 }
0x14e4   :  { %783 = vrot.lane.b32.xlu0 %v1159_v33, %s1183_s30 }
0x1556   :  { %v784_v35 = vpop.permute.xlu0 %783 }
0x1557   :  { %v786_v36 = vmul.f32 %v1157_v26, %v784_v35 }
0x1559   :  { %v791_v37 = vrot.slane %v786_v36, %v790_v34 }
0x155b   :  { %v792_v38 = vsel %vm787_vm11, %v791_v37, %v707_v14 }
0x155c   :  { %v793_v39 = vpack.c.bf16 %v792_v38, %v792_v38 }
0x155e   :  { %806 = vrot.lane.b32.xlu1 %v793_v39, %s1188_s2 }
0x15d0   :  { %v807_v40 = vpop.permute.xlu1 %806 }
0x15d1   :  { %1072 = vmatmul.mubr.msk.bf16.vlgmr.msra.gmra.mxu1 %vm119_vm3, %v807_v40 }
0x1691   :  { %v857_v42 = vpop.f32.mrf.mxu1 }
0x1692   :  { %v858_v43 = vadd.f32 %v957_v0, %v857_v42 }
0x1693   :  { %v1073_v52 = vpop.f32.mrf.mxu1 }
0x1694   :  { %v863_v44 = vmax.f32 %v858_v43, 0.0 }
0x1695   :  { %v860_v45 = vpop.f32.mrf.mxu1 }
0x1696   :  { %v864_v46 = vpack.c.bf16 %v863_v44, %v863_v44 }
0x1697   :  { %v1074_v47 = vpop.f32.mrf.mxu1 }
0x1698   :  { %1080 = vmatmul.mubr.msk.bf16.vlgmr.msra.gmra.mxu0 %vm119_vm3, %v864_v46 }
0x1758   :  { %v925_v49 = vpop.f32.mrf.mxu0 }
0x1759   :  { %v926_v50 = vadd.f32 %v961_v48, %v925_v49 }
0x175a   :  { %v1081_v51 = vpop.f32.mrf.mxu0 }
0x175b   :  { %932 = vst.msk [vmem:[%s1409_s8] sm:$0xff] %vm931_vm12, %v926_v50 }
0x175c   :  { %v928_v53 = vpop.f32.mrf.mxu0 }
0x175e   :  { %v1082_v54 = vpop.f32.mrf.mxu0 }
0x175f   :  { %937 = vsyncpa [#allocation3], 1 }

</bundles_post_ra>
